<compile_context>
chip_gen: v7x
topology: tpu7x:2x2x1
jax: 0.10.0
libtpu: 0.0.40
codegen_flags: <defaults>
</compile_context>

<pallas_src>
import jax
import jax.numpy as jnp
from jax import lax
from jax.experimental import pallas as pl
from jax.experimental.pallas import tpu as pltpu


def _critic_kernel(x_ref, w1_ref, b1_ref, w2_ref, b2_ref, w3_ref, scal_ref,
                   o_ref):
    # x tile arrives in its natural (TILE_B, F) layout (no wrapper transpose).
    x = x_ref[...].astype(jnp.float32)                    # (TILE_B, F)

    # --- F.normalize over features: x * rsqrt(max(||x||^2, 1e-24)) ---
    # (numerically equivalent to x / max(||x||, 1e-12); padded zero rows stay 0)
    sq = jnp.sum(x * x, axis=1, keepdims=True)            # (TILE_B, 1)
    xn = x * lax.rsqrt(jnp.maximum(sq, 1e-24))

    # Scalars from SMEM (scalar path, no vector load + broadcast).
    a1 = scal_ref[0]
    a2 = scal_ref[1]
    b3 = scal_ref[2]

    # --- Linear 1 + PReLU: contract on the feature axis of both operands.
    #     (H, F) x (TILE_B, F) -> (H, TILE_B)   [w1 @ x^T on the MXU]
    h = lax.dot_general(w1_ref[...], xn, (((1,), (1,)), ((), ())),
                        preferred_element_type=jnp.float32) + b1_ref[...]
    h = jnp.where(h >= 0.0, h, a1 * h)

    # --- Linear 2 + PReLU: (H, H) @ (H, TILE_B) -> (H, TILE_B) ---
    h = jnp.dot(w2_ref[...], h, preferred_element_type=jnp.float32) + b2_ref[...]
    h = jnp.where(h >= 0.0, h, a2 * h)

    # --- Linear 3 (hidden -> 1): VPU multiply + sublane reduce.
    # Result is lane-dense (1, TILE_B) -> unmasked stores, MXU left free.
    out = jnp.sum(w3_ref[...] * h, axis=0, keepdims=True) + b3
    o_ref[...] = out.astype(o_ref.dtype)


def _round_up(n, m):
    return ((n + m - 1) // m) * m


def critic_forward(x, params, *, tile_b=4096, min_pallas_batch=64,
                   use_bf16_input=False, x_buffers=2):
    """Critic forward pass as a single batched-grid Pallas TPU kernel.

    x: (B, obs+act) or (obs+act,) float32
    params: dict with
      w1 (H, F), b1 (H, 1), a1 (1, 1),
      w2 (H, H), b2 (H, 1), a2 (1, 1),
      w3 (H, 1), b3 (1, 1)          (torch nn.Linear (out, in) layout; w3
                                     stored transposed for the lane reduce)
    """
    squeeze = x.ndim == 1
    if squeeze:
        # torch path: normalize(dim=0) on a vector == normalize(dim=1) of (1, F)
        x = x[None, :]
    x = x.astype(jnp.float32)
    B, F = x.shape

    # --- tiny-batch / single-sample bypass: fused XLA dot chain is faster than
    #     padding to 128 lanes + pallas_call fixed overhead.
    if B < min_pallas_batch:
        norm = jnp.sqrt(jnp.sum(x * x, axis=1, keepdims=True))
        xn = x / jnp.maximum(norm, 1e-12)
        h = xn @ params["w1"].T + params["b1"][:, 0]
        h = jnp.where(h >= 0, h, params["a1"][0, 0] * h)
        h = h @ params["w2"].T + params["b2"][:, 0]
        h = jnp.where(h >= 0, h, params["a2"][0, 0] * h)
        out = h @ params["w3"] + params["b3"][0]
        return out[0] if squeeze else out

    w1, b1 = params["w1"], params["b1"]
    w2, b2 = params["w2"], params["b2"]
    w3 = params["w3"]
    H = w1.shape[0]

    # a1 / a2 / b3 packed into one small SMEM operand.
    scal = jnp.concatenate([params["a1"].reshape(1), params["a2"].reshape(1),
                            params["b3"].reshape(1)]).astype(jnp.float32)

    # --- batch tiling: big lane tiles, and >= 2 grid steps whenever there is
    #     enough work so both v7x TensorCores get a share ("parallel" axis).
    b_aligned = _round_up(B, 128)
    tile = min(_round_up(tile_b, 128), b_aligned)
    if b_aligned >= 256:
        tile = min(tile, _round_up(b_aligned // 2, 128))
    tile = max(tile, 128)
    b_pad = _round_up(B, tile)
    num_tiles = b_pad // tile

    if b_pad != B:
        x = jnp.pad(x, ((0, b_pad - B), (0, 0)))
    if use_bf16_input:
        # Halves HBM bytes for the only large streamed operand; kernel upcasts
        # to f32 before the normalize / matmuls, so compute stays f32.
        x = x.astype(jnp.bfloat16)

    x_spec_kwargs = {}
    if x_buffers != 2:
        x_spec_kwargs["pipeline_mode"] = pl.Buffered(x_buffers)
    x_spec = pl.BlockSpec((tile, F), lambda i: (i, 0), **x_spec_kwargs)

    def vmem_const(shape):
        # Whole-array weight/bias block, constant index_map -> VMEM-resident.
        return pl.BlockSpec(shape, lambda i: (0, 0))

    smem_spec = pl.BlockSpec(memory_space=pltpu.MemorySpace.SMEM)

    x_bytes = b_pad * F * (2 if use_bf16_input else 4)
    flops = 2 * b_pad * (H * F + H * H + H) + 5 * b_pad * F
    bytes_accessed = x_bytes + 4 * (b_pad + H * F + H * H + 3 * H + 3)
    cost = pl.CostEstimate(flops=flops, transcendentals=b_pad,
                           bytes_accessed=bytes_accessed)

    out = pl.pallas_call(
        _critic_kernel,
        out_shape=jax.ShapeDtypeStruct((1, b_pad), jnp.float32),
        grid=(num_tiles,),
        in_specs=[
            x_spec,                                       # x tile (pipelined)
            vmem_const((H, F)),                           # w1
            vmem_const((H, 1)),                           # b1
            vmem_const((H, H)),                           # w2
            vmem_const((H, 1)),                           # b2
            vmem_const((H, 1)),                           # w3 (as column)
            smem_spec,                                    # [a1, a2, b3]
        ],
        out_specs=pl.BlockSpec((1, tile), lambda i: (0, i)),
        compiler_params=pltpu.CompilerParams(
            dimension_semantics=("parallel",)),
        cost_estimate=cost,
    )(x, w1, b1, w2, b2, w3, scal)

    out = out.reshape(-1)[:B][:, None]                    # (B, 1)
    return out[0] if squeeze else out


def init_critic_params(key, observation_space_size, action_dim, hidden_size):
    """Deterministic parameter init mirroring nn.Linear / nn.PReLU defaults."""
    in_features = observation_space_size + action_dim
    k1, k2, k3, k4, k5, k6 = jax.random.split(key, 6)

    def linear_init(kw, kb, fan_in, fan_out):
        bound = 1.0 / jnp.sqrt(jnp.float32(fan_in))
        # torch nn.Linear layout: weight (out, in), bias stored as (out, 1)
        w = jax.random.uniform(kw, (fan_out, fan_in), jnp.float32, -bound, bound)
        b = jax.random.uniform(kb, (fan_out, 1), jnp.float32, -bound, bound)
        return w, b

    w1, b1 = linear_init(k1, k2, in_features, hidden_size)
    w2, b2 = linear_init(k3, k4, hidden_size, hidden_size)
    w3, b3 = linear_init(k5, k6, hidden_size, 1)          # w3: (1, H), b3: (1, 1)

    # nn.PReLU(): single learnable slope initialized to 0.25
    a1 = jnp.full((1, 1), 0.25, jnp.float32)
    a2 = jnp.full((1, 1), 0.25, jnp.float32)

    return {"w1": w1, "b1": b1, "a1": a1,
            "w2": w2, "b2": b2, "a2": a2,
            "w3": w3.T, "b3": b3}                         # w3 stored as (H, 1)


def _reference_forward(x, params):
    """Pure-JAX reference with exact torch semantics (sqrt/max/divide norm)."""
    if x.ndim == 1:
        x = x[None, :]
        squeeze = True
    else:
        squeeze = False
    norm = jnp.sqrt(jnp.sum(x * x, axis=1, keepdims=True))
    x = x / jnp.maximum(norm, 1e-12)
    h = x @ params["w1"].T + params["b1"][:, 0]
    h = jnp.where(h >= 0, h, params["a1"][0, 0] * h)
    h = h @ params["w2"].T + params["b2"][:, 0]
    h = jnp.where(h >= 0, h, params["a2"][0, 0] * h)
    out = h @ params["w3"] + params["b3"][0]              # w3 is (H, 1)
    return out[0] if squeeze else out


if __name__ == "__main__":
    # Shapes consistent with the module: obs=12, action=4, hidden=32.
    observation_space_size = 12
    action_dim = 4
    hidden_size = 32
    F = observation_space_size + action_dim

    key = jax.random.PRNGKey(0)
    k_params, k_x = jax.random.split(key)
    params = init_critic_params(k_params, observation_space_size, action_dim,
                                hidden_size)

    # 1) Pallas path: batch large enough for the kernel (2 grid steps -> both
    #    TensorCores get work on v7x; single TC on v5e/v6e just loops).
    batch = 256
    x = jax.random.normal(k_x, (batch, F), jnp.float32)
    out = jax.block_until_ready(critic_forward(x, params))
    ref = _reference_forward(x, params)
    assert out.shape == (batch, 1), out.shape
    assert jnp.allclose(out, ref, atol=1e-4, rtol=1e-4)

    # 2) Pallas path forced at a tiny batch (pads to one 128-lane tile).
    x_small = x[:8]
    out_s = jax.block_until_ready(
        critic_forward(x_small, params, min_pallas_batch=1))
    ref_s = _reference_forward(x_small, params)
    assert out_s.shape == (8, 1), out_s.shape
    assert jnp.allclose(out_s, ref_s, atol=1e-4, rtol=1e-4)

    # 3) Default tiny-batch bypass (fused XLA path) + torch 1-D (single sample).
    out_b = jax.block_until_ready(critic_forward(x_small, params))
    assert jnp.allclose(out_b, ref_s, atol=1e-4, rtol=1e-4)
    out_1d = jax.block_until_ready(critic_forward(x[0], params))
    ref_1d = _reference_forward(x[0], params)
    assert out_1d.shape == (1,), out_1d.shape
    assert jnp.allclose(out_1d, ref_1d, atol=1e-4, rtol=1e-4)

    # 4) Optional bf16-streamed-x variant (halves HBM bytes for x); looser
    #    tolerance because only the input is quantized — compute stays f32.
    out_bf = jax.block_until_ready(
        critic_forward(x, params, use_bf16_input=True))
    assert out_bf.shape == (batch, 1), out_bf.shape
    assert jnp.allclose(out_bf, ref, atol=5e-2, rtol=5e-2)

    print("KERNEL_OK")
</pallas_src>

<mosaic_0001>
module attributes {stable_mosaic.version = 11 : i64} {
  func.func @_critic_kernel(%arg0: i32, %arg1: memref<128x16xf32, #tpu.memory_space<vmem>>, %arg2: memref<32x16xf32, #tpu.memory_space<vmem>>, %arg3: memref<32x1xf32, #tpu.memory_space<vmem>>, %arg4: memref<32x32xf32, #tpu.memory_space<vmem>>, %arg5: memref<32x1xf32, #tpu.memory_space<vmem>>, %arg6: memref<32x1xf32, #tpu.memory_space<vmem>>, %arg7: memref<3xf32, #tpu.memory_space<smem>>, %arg8: memref<1x128xf32, #tpu.memory_space<vmem>>) attributes {dimension_semantics = [#tpu.dimension_semantics<parallel>], iteration_bounds = array<i64: 2>, scalar_prefetch = 0 : i64, scratch_operands = 0 : i64, tpu.core_type = #tpu.core_type<tc>, window_params = [{transform_indices = @transform_0, window_bounds = array<i64: 128, 16>}, {pipeline_mode = #tpu.pipeline_mode<synchronous>, transform_indices = @transform_1, window_bounds = array<i64: 32, 16>}, {pipeline_mode = #tpu.pipeline_mode<synchronous>, transform_indices = @transform_2, window_bounds = array<i64: 32, 1>}, {pipeline_mode = #tpu.pipeline_mode<synchronous>, transform_indices = @transform_3, window_bounds = array<i64: 32, 32>}, {pipeline_mode = #tpu.pipeline_mode<synchronous>, transform_indices = @transform_4, window_bounds = array<i64: 32, 1>}, {pipeline_mode = #tpu.pipeline_mode<synchronous>, transform_indices = @transform_5, window_bounds = array<i64: 32, 1>}, {transform_indices = @transform_6, window_bounds = array<i64: 3>}, {transform_indices = @transform_7, window_bounds = array<i64: 1, 128>}]} {
    %c0 = arith.constant 0 : index
    %c0_0 = arith.constant 0 : index
    %0 = vector.load %arg1[%c0, %c0_0] : memref<128x16xf32, #tpu.memory_space<vmem>>, vector<128x16xf32>
    %1 = arith.mulf %0, %0 : vector<128x16xf32>
    %cst = arith.constant dense<0.000000e+00> : vector<128xf32>
    %2 = vector.multi_reduction <add>, %1, %cst [1] : vector<128x16xf32> to vector<128xf32>
    %3 = vector.shape_cast %2 : vector<128xf32> to vector<128x1xf32>
    %cst_1 = arith.constant 1.000000e-24 : f32
    %4 = vector.broadcast %cst_1 : f32 to vector<128x1xf32>
    %5 = arith.maximumf %3, %4 : vector<128x1xf32>
    %6 = math.rsqrt %5 : vector<128x1xf32>
    %7 = vector.broadcast %6 : vector<128x1xf32> to vector<128x16xf32>
    %8 = arith.mulf %0, %7 : vector<128x16xf32>
    %c0_2 = arith.constant 0 : index
    %9 = memref.load %arg7[%c0_2] : memref<3xf32, #tpu.memory_space<smem>>
    %c1 = arith.constant 1 : index
    %10 = memref.load %arg7[%c1] : memref<3xf32, #tpu.memory_space<smem>>
    %c2 = arith.constant 2 : index
    %11 = memref.load %arg7[%c2] : memref<3xf32, #tpu.memory_space<smem>>
    %c0_3 = arith.constant 0 : index
    %c0_4 = arith.constant 0 : index
    %12 = vector.load %arg2[%c0_3, %c0_4] : memref<32x16xf32, #tpu.memory_space<vmem>>, vector<32x16xf32>
    %cst_5 = arith.constant dense<0.000000e+00> : vector<32x128xf32>
    %13 = tpu.matmul %12, %8, %cst_5 {dimension_numbers = #tpu.dot_dimension_numbers<[1], [1], [0], [0], [0, 0, 1, 0], [], []>} : vector<32x16xf32>, vector<128x16xf32>, vector<32x128xf32> -> vector<32x128xf32>
    %c0_6 = arith.constant 0 : index
    %c0_7 = arith.constant 0 : index
    %14 = vector.load %arg3[%c0_6, %c0_7] : memref<32x1xf32, #tpu.memory_space<vmem>>, vector<32x1xf32>
    %15 = vector.broadcast %14 : vector<32x1xf32> to vector<32x128xf32>
    %16 = arith.addf %13, %15 : vector<32x128xf32>
    %cst_8 = arith.constant 0.000000e+00 : f32
    %17 = vector.broadcast %cst_8 : f32 to vector<32x128xf32>
    %18 = arith.cmpf oge, %16, %17 : vector<32x128xf32>
    %19 = vector.broadcast %9 : f32 to vector<32x128xf32>
    %20 = arith.mulf %19, %16 : vector<32x128xf32>
    %21 = arith.select %18, %16, %20 : vector<32x128xi1>, vector<32x128xf32>
    %c0_9 = arith.constant 0 : index
    %c0_10 = arith.constant 0 : index
    %22 = vector.load %arg4[%c0_9, %c0_10] : memref<32x32xf32, #tpu.memory_space<vmem>>, vector<32x32xf32>
    %cst_11 = arith.constant dense<0.000000e+00> : vector<32x128xf32>
    %23 = tpu.matmul %22, %21, %cst_11 {dimension_numbers = #tpu.dot_dimension_numbers<[1], [0], [0], [1], [0, 0, 1, 1], [], []>} : vector<32x32xf32>, vector<32x128xf32>, vector<32x128xf32> -> vector<32x128xf32>
    %c0_12 = arith.constant 0 : index
    %c0_13 = arith.constant 0 : index
    %24 = vector.load %arg5[%c0_12, %c0_13] : memref<32x1xf32, #tpu.memory_space<vmem>>, vector<32x1xf32>
    %25 = vector.broadcast %24 : vector<32x1xf32> to vector<32x128xf32>
    %26 = arith.addf %23, %25 : vector<32x128xf32>
    %cst_14 = arith.constant 0.000000e+00 : f32
    %27 = vector.broadcast %cst_14 : f32 to vector<32x128xf32>
    %28 = arith.cmpf oge, %26, %27 : vector<32x128xf32>
    %29 = vector.broadcast %10 : f32 to vector<32x128xf32>
    %30 = arith.mulf %29, %26 : vector<32x128xf32>
    %31 = arith.select %28, %26, %30 : vector<32x128xi1>, vector<32x128xf32>
    %c0_15 = arith.constant 0 : index
    %c0_16 = arith.constant 0 : index
    %32 = vector.load %arg6[%c0_15, %c0_16] : memref<32x1xf32, #tpu.memory_space<vmem>>, vector<32x1xf32>
    %33 = vector.broadcast %32 : vector<32x1xf32> to vector<32x128xf32>
    %34 = arith.mulf %33, %31 : vector<32x128xf32>
    %cst_17 = arith.constant dense<0.000000e+00> : vector<128xf32>
    %35 = vector.multi_reduction <add>, %34, %cst_17 [0] : vector<32x128xf32> to vector<128xf32>
    %36 = vector.shape_cast %35 : vector<128xf32> to vector<1x128xf32>
    %37 = vector.broadcast %11 : f32 to vector<1x128xf32>
    %38 = arith.addf %36, %37 : vector<1x128xf32>
    %c0_18 = arith.constant 0 : index
    %c0_19 = arith.constant 0 : index
    %39 = vector.load %arg8[%c0_18, %c0_19] : memref<1x128xf32, #tpu.memory_space<vmem>>, vector<1x128xf32>
    tpu.vector_store %arg8[%c0_18, %c0_19], %38 {strides = array<i32>} : memref<1x128xf32, #tpu.memory_space<vmem>>, vector<1x128xf32>,
    return
  }
  func.func @transform_0(%arg0: i32) -> (i32, i32) {
    %c0_i32 = arith.constant 0 : i32
    %c0_i32_0 = arith.constant 0 : i32
    return %arg0, %c0_i32 : i32, i32
  }
  func.func @transform_1(%arg0: i32) -> (i32, i32) {
    %c0_i32 = arith.constant 0 : i32
    %c0_i32_0 = arith.constant 0 : i32
    %c0_i32_1 = arith.constant 0 : i32
    return %c0_i32, %c0_i32_0 : i32, i32
  }
  func.func @transform_2(%arg0: i32) -> (i32, i32) {
    %c0_i32 = arith.constant 0 : i32
    %c0_i32_0 = arith.constant 0 : i32
    %c0_i32_1 = arith.constant 0 : i32
    return %c0_i32, %c0_i32_0 : i32, i32
  }
  func.func @transform_3(%arg0: i32) -> (i32, i32) {
    %c0_i32 = arith.constant 0 : i32
    %c0_i32_0 = arith.constant 0 : i32
    %c0_i32_1 = arith.constant 0 : i32
    return %c0_i32, %c0_i32_0 : i32, i32
  }
  func.func @transform_4(%arg0: i32) -> (i32, i32) {
    %c0_i32 = arith.constant 0 : i32
    %c0_i32_0 = arith.constant 0 : i32
    %c0_i32_1 = arith.constant 0 : i32
    return %c0_i32, %c0_i32_0 : i32, i32
  }
  func.func @transform_5(%arg0: i32) -> (i32, i32) {
    %c0_i32 = arith.constant 0 : i32
    %c0_i32_0 = arith.constant 0 : i32
    %c0_i32_1 = arith.constant 0 : i32
    return %c0_i32, %c0_i32_0 : i32, i32
  }
  func.func @transform_6(%arg0: i32) -> i32 {
    %c0_i32 = arith.constant 0 : i32
    %c0_i32_0 = arith.constant 0 : i32
    return %c0_i32 : i32
  }
  func.func @transform_7(%arg0: i32) -> (i32, i32) {
    %c0_i32 = arith.constant 0 : i32
    %c0_i32_0 = arith.constant 0 : i32
    return %c0_i32, %arg0 : i32, i32
  }
}

</mosaic_0001>

<bundles_post_ra>
// kernel: tpu_custom_call.1
= control target key start
LH: loop header
LB: loop body
LE: loop exit
PB: predicated region body
PF: predicated region fallthrough
CT: control target
= control target key end

     0   :  { %12 = vsyncpa [#allocation4], 0  ;;  %s1594_s0 = inlined_call_operand.vmem [shape: f32[256,16], index: 0, kind: input, shape index: {}]   ;;  %s1595_s1 = inlined_call_operand.vmem [shape: f32[32,16], index: 1, kind: input, shape index: {}]   ;;  %s1596_s2 = inlined_call_operand.vmem [shape: f32[32,1], index: 2, kind: input, shape index: {}]   ;;  %s1597_s3 = inlined_call_operand.vmem [shape: f32[32,32], index: 3, kind: input, shape index: {}]   ;;  %s1598_s4 = inlined_call_operand.vmem [shape: f32[32,1], index: 4, kind: input, shape index: {}]   ;;  %s1599_s5 = inlined_call_operand.vmem [shape: f32[32,1], index: 5, kind: input, shape index: {}]   ;;  %s1600_s6 = inlined_call_operand.vmem [shape: f32[3], index: 6, kind: input, shape index: {}]   ;;  %s1601_s7 = inlined_call_operand.hbm [shape: f32[1,256], index: 7, kind: output, shape index: {}]  }
   0x1   :  { %13 = vsyncpa [#allocation3], 0 }
   0x2   :  { %15 = vsyncpa [#allocation3 + $0x1], 0  ;;  %s1253_s24 = smov 0   ;;  %s1255_s25 = smov 0  }
   0x3   :  { %s1257_s26 = smov 0   ;;  %s1259_s27 = smov 0  }
   0x4 LB: > { %s1274_s28 = sadd.s32 4294967295, %s1208_s27   ;;  %s869_s29 = sadd.s32 4294967294, %s1208_s27   ;;  %s1208_s27 = sphi %s1259_s27, %s1610_s27   ;;  %s1204_s26 = sphi %s1257_s26, %s1609_s26   ;;  %s1200_s25 = sphi %s1255_s25, %s1608_s25   ;;  %s1196_s24 = sphi %s1253_s24, %s1607_s24  }
   0x5   : > { %s1278_s30 = sadd.s32 1, %s1208_s27   ;;  %s180_s8 = sadd.s32 1, %s1204_s26 }
   0x6   : > { %s177_s9 = ssub.s32 %s1208_s27, %s1278_s30  ;;  %p190_p0 = scmp.ne.s32.totalorder %s1204_s26, %s1200_s25 }
   0x7   : > { %p178_p1 = scmp.eq.s32.totalorder %s177_s9, 0  ;;  %p191_p2 = scmp.eq.s32.totalorder %s1274_s28, 1 }
   0x8   : > { %p196_p3 = scmp.ne.s32.totalorder %s1200_s25, %s1196_s24  ;;  %p197_p4 = scmp.eq.s32.totalorder %s869_s29, 1 }
   0x9   : > { %s1289_s10 = scalar_select %p178_p1, %s1204_s26, %s180_s8  }
   0xa   : > { %p1291_p5 = por %p191_p2, %p190_p0  ;;  %p1295_p6 = por %p197_p4, %p196_p3 }
   0xb   : > { %p870_p7 = scmp.ge.s32.totalorder %s1208_s27, 1  ;;  %p204_p8 = scmp.lt.s32.totalorder %s1208_s27, 3 }
   0xc   : > { %p1056_p9 = scmp.eq.s32.totalorder %s1274_s28, 0  ;;  %s232_s16 = sshll.u32 %s1600_s6, 4  ;;  %s233_s16 = int_to_ptr.vmem [resolvable:$true] %s232_s16 }
   0xd   : > { %p1302_p10 = pnand %p870_p7, %p204_p8  ;;  %s1127_s17 = scalar_lea.vmem %s233_s16, 16 }
   0xe   : > { %p1128_p13 = scmp.ne.s32.totalorder %s233_s16, %s1127_s17  ;;  %p1135_p3 = scmp.lt.s32.totalorder %s233_s16, %s233_s16 }
   0xf   : > { %p1048_p11 = pneg %p1302_p10  ;;  %p1136_p4 = scmp.lt.s32.totalorder %s1127_s17, %s1127_s17 }
  0x11   : > { %p1049_p12 = pnand %p1056_p9, %p1048_p11  ;;  %p1137_p7 = por %p1136_p4, %p1135_p3 }
  0x13   : > { %p1129_p0 = pneg %p1049_p12 }
  0x15   : > { %p1130_p1 = pnand %p1129_p0, %p1128_p13 }
  0x17   : > { %p1131_p2 = pneg %p1130_p1 }
  0x19   : > { %p1138_p8 = pnand %p1137_p7, %p1131_p2 }
  0x1b   : > { %1141 = shalt.err (!%p1138_p8)
}
  0x1c   : > { %s1210_s18 = smov [#allocation2]   ;;  %254 = sbr.rel (%p1302_p10) target bundleno = 760 (0x2f8), region = 48 }
  0x1d   : > { %1051 = dma.vmem_to_smem (!%p1049_p12), %s233_s16, 16, %s1210_s18, [#allocation4]  }
  0x23   : > { %1187 = dma.done.wait (%p1056_p9), [#allocation4], 16  }
  0x24   : > { %1189 = vsyncadd (%p1056_p9), [#allocation4], 4294967280 }
  0x25   : > { %260 = sfence }
  0x26   : > { %s1320_s19 = sshll.u32 %s1274_s28, 4  ;;  %vm324_vm0 = vcmask 130048   ;;  %v424_v48 = vld [vmem:[%s1595_s1] sm:$0xff]  ;;  %v429_v49 = vld [vmem:[%s1596_s2 + $0x8] sm:$0xff]  ;;  %v1211_v50 = vmov 0   ;;  %v430_v52 = vld [vmem:[%s1596_s2 + $0x10] sm:$0xff] }
  0x27   : > { %p287_p11 = scmp.lt.s32.totalorder %s1320_s19, 31  ;;  %966 = vmatprep.mubr.msk.f32.mxu0 %vm324_vm0, %v424_v48  ;;  %1094 = vset.pattern.permute.xlu1 %v1211_v50  ;;  %v428_v51 = vld [vmem:[%s1596_s2] sm:$0xff]  ;;  %v750_v53 = vld [vmem:[%s1599_s5 + $0x8] sm:$0xff]  ;;  %v431_v54 = vld [vmem:[%s1596_s2 + $0x18] sm:$0xff]  ;;  %vm638_vm2 = vcmask 261120   ;;  %s421_s16 = sld [smem:[#allocation2]] }
  0x28   : > { %1093 = vset.pattern.permute.xlu0 %v1211_v50  ;;  %v752_v55 = vld [vmem:[%s1599_s5 + $0x18] sm:$0xff]  ;;  %v614_v56 = vld [vmem:[%s1598_s4] sm:$0xff]  ;;  %v615_v57 = vld [vmem:[%s1598_s4 + $0x8] sm:$0xff]  ;;  %s878_s28 = sld [smem:[#allocation2 + $0x2]]  ;;  %s284_s8 = sand.u32 1, %s1200_s25  }
  0x29   : > { %s288_s20 = scalar_select %p287_p11, %s1320_s19, 31  ;;  %v616_v58 = vld [vmem:[%s1598_s4 + $0x10] sm:$0xff]  ;;  %v617_v59 = vld [vmem:[%s1598_s4 + $0x18] sm:$0xff]  ;;  %v749_v60 = vld [vmem:[%s1599_s5] sm:$0xff] }
  0x2a   : > { %v751_v61 = vld [vmem:[%s1599_s5 + $0x10] sm:$0xff]  ;;  %vm1470_vm1 = vmpackc.low %vm324_vm0, %vm324_vm0  ;;  %s285_s9 = scalar_lea.vmem [#allocation5], %s284_s8  ;;  %s790_s17 = scalar_lea.sflag [#allocation3], %s284_s8 }
  0x2b   : > { %s876_s21 = sshll.u32 %s288_s20, 3  ;;  %s802_s13 = sshll.u32 %s285_s9, 4  ;;  %s1554_s13 = int_to_ptr.vmem [resolvable:$true] %s802_s13 }
  0x2c   : > { %s1327_s29 = scalar_lea.vmem %s1594_s0, %s876_s21  ;;  %s1142_s18 = scalar_lea.vmem %s1554_s13, 16 }
  0x2d   : > { %v1330_v0 = vld [vmem:[%s1327_s29] sm:$0xff]  ;;  %v1333_v1 = vld [vmem:[%s1327_s29 + $0x10] sm:$0xff]  ;;  %v1336_v2 = vld [vmem:[%s1327_s29 + $0x8] sm:$0xff]  ;;  %p1143_p9 = scmp.ne.s32.totalorder %s1554_s13, %s1142_s18  ;;  %s1212_s20 = smov [#allocation5]  }
  0x2e   : > { %v308_v3 = vmul.f32 %v1330_v0, %v1330_v0  ;;  %v310_v4 = vmul.f32 %v1333_v1, %v1333_v1  ;;  %v309_v5 = vmul.f32 %v1336_v2, %v1336_v2  ;;  %v1345_v6 = vld [vmem:[%s1327_s29 + $0x18] sm:$0xff]  ;;  %v1350_v8 = vld [vmem:[%s1327_s29 + $0x28] sm:$0xff]  ;;  %v1353_v9 = vld [vmem:[%s1327_s29 + $0x20] sm:$0xff]  ;;  %s1146_s21 = sshll.u32 %s1212_s20, 4  ;;  %s1147_s21 = int_to_ptr.vmem [resolvable:$false] %s1146_s21 }
  0x2f   : > { %v311_v7 = vmul.f32 %v1345_v6, %v1345_v6  ;;  %v313_v14 = vmul.f32 %v1350_v8, %v1350_v8  ;;  %v312_v15 = vmul.f32 %v1353_v9, %v1353_v9  ;;  %v1364_v16 = vld [vmem:[%s1327_s29 + $0x38] sm:$0xff]  ;;  %v1367_v17 = vld [vmem:[%s1327_s29 + $0x30] sm:$0xff]  ;;  %v1376_v22 = vld [vmem:[%s1327_s29 + $0x48] sm:$0xff]  ;;  %p1144_p10 = pnand %p1143_p9, %p1291_p5  ;;  %s1148_s22 = scalar_lea.vmem %s1147_s21, 32 }
  0x30   : > { %v325_v10 = vsel %vm324_vm0, %v308_v3, 0.0  ;;  %v331_v11 = vsel %vm324_vm0, %v310_v4, 0.0  ;;  %v328_v12 = vsel %vm324_vm0, %v309_v5, 0.0  ;;  %v315_v20 = vmul.f32 %v1364_v16, %v1364_v16  ;;  %v1379_v23 = vld [vmem:[%s1327_s29 + $0x40] sm:$0xff]  ;;  %v1388_v28 = vld [vmem:[%s1327_s29 + $0x58] sm:$0xff]  ;;  %v1391_v29 = vld [vmem:[%s1327_s29 + $0x50] sm:$0xff]  ;;  %p1149_p13 = scmp.lt.s32.totalorder %s1554_s13, %s1147_s21  ;;  %p1150_p0 = scmp.lt.s32.totalorder %s1148_s22, %s1142_s18 }
  0x31   : > { %326 = vadd.xlane.f32.xlu0 %v325_v10  ;;  %332 = vadd.xlane.f32.xlu1 %v331_v11  ;;  %v334_v13 = vsel %vm324_vm0, %v311_v7, 0.0  ;;  %v340_v18 = vsel %vm324_vm0, %v313_v14, 0.0  ;;  %v337_v19 = vsel %vm324_vm0, %v312_v15, 0.0  ;;  %v314_v21 = vmul.f32 %v1367_v17, %v1367_v17  ;;  %v1400_v34 = vld [vmem:[%s1327_s29 + $0x68] sm:$0xff]  ;;  %v1403_v35 = vld [vmem:[%s1327_s29 + $0x60] sm:$0xff]  ;;  %v1412_v40 = vld [vmem:[%s1327_s29 + $0x78] sm:$0xff]  ;;  %p1145_p12 = pneg %p1144_p10 }
  0x32   : > { %v346_v24 = vsel %vm324_vm0, %v315_v20, 0.0  ;;  %v317_v26 = vmul.f32 %v1376_v22, %v1376_v22  ;;  %v316_v27 = vmul.f32 %v1379_v23, %v1379_v23  ;;  %v319_v32 = vmul.f32 %v1388_v28, %v1388_v28  ;;  %v1415_v41 = vld [vmem:[%s1327_s29 + $0x70] sm:$0xff]  ;;  %s877_s29 = sld [smem:[#allocation2 + $0x1]]  ;;  %p1151_p1 = por %p1150_p0, %p1149_p13 }
  0x33   : > { %v343_v25 = vsel %vm324_vm0, %v314_v21, 0.0  ;;  %v318_v33 = vmul.f32 %v1391_v29, %v1391_v29  ;;  %v321_v38 = vmul.f32 %v1400_v34, %v1400_v34  ;;  %v320_v39 = vmul.f32 %v1403_v35, %v1403_v35 }
  0x34   : > { %v352_v30 = vsel %vm324_vm0, %v317_v26, 0.0  ;;  %v349_v31 = vsel %vm324_vm0, %v316_v27, 0.0  ;;  %v358_v36 = vsel %vm324_vm0, %v319_v32, 0.0  ;;  %v323_v44 = vmul.f32 %v1412_v40, %v1412_v40  ;;  %p1152_p2 = pnand %p1151_p1, %p1145_p12 }
  0x35   : > { %329 = vadd.xlane.f32.xlu0 %v328_v12  ;;  %335 = vadd.xlane.f32.xlu1 %v334_v13  ;;  %v355_v37 = vsel %vm324_vm0, %v318_v33, 0.0  ;;  %v364_v42 = vsel %vm324_vm0, %v321_v38, 0.0  ;;  %v361_v43 = vsel %vm324_vm0, %v320_v39, 0.0  ;;  %v322_v45 = vmul.f32 %v1415_v41, %v1415_v41 }
  0x36   : > { %v370_v46 = vsel %vm324_vm0, %v323_v44, 0.0 }
  0x37   : > { %v367_v47 = vsel %vm324_vm0, %v322_v45, 0.0 }
  0x39   : > { %341 = vadd.xlane.f32.xlu1 %v340_v18  ;;  %338 = vadd.xlane.f32.xlu0 %v337_v19 }
  0x3d   : > { %347 = vadd.xlane.f32.xlu1 %v346_v24  ;;  %344 = vadd.xlane.f32.xlu0 %v343_v25 }
  0x41   : > { %353 = vadd.xlane.f32.xlu1 %v352_v30  ;;  %350 = vadd.xlane.f32.xlu0 %v349_v31 }
  0x45   : > { %359 = vadd.xlane.f32.xlu1 %v358_v36  ;;  %356 = vadd.xlane.f32.xlu0 %v355_v37 }
  0x49   : > { %365 = vadd.xlane.f32.xlu1 %v364_v42  ;;  %362 = vadd.xlane.f32.xlu0 %v361_v43 }
  0x4d   : > { %371 = vadd.xlane.f32.xlu1 %v370_v46  ;;  %368 = vadd.xlane.f32.xlu0 %v367_v47 }
  0x5e   : > { %439 = vperm.xlu1 %1094, %v429_v49  }
  0x62   : > { %444 = vperm.xlu1 %1094, %v430_v52  }
  0x63   : > { %434 = vperm.xlu0 %1093, %v428_v51  }
  0x66   : > { %449 = vperm.xlu1 %1094, %v431_v54  }
  0x67   : > { %760 = vperm.xlu0 %1093, %v750_v53  }
  0x6a   : > { %620 = vperm.xlu1 %1094, %v614_v56  }
  0x6b   : > { %770 = vperm.xlu0 %1093, %v752_v55  }
  0x6e   : > { %625 = vperm.xlu1 %1094, %v615_v57  }
  0x72   : > { %630 = vperm.xlu1 %1094, %v616_v58  }
  0x76   : > { %635 = vperm.xlu1 %1094, %v617_v59  }
  0x7a   : > { %755 = vperm.xlu1 %1094, %v749_v60  }
  0x7e   : > { %765 = vperm.xlu1 %1094, %v751_v61  }
  0xbe   : > { %v327_v62 = vpop.xlane.xlu0 %326  ;;  %v333_v63 = vpop.xlane.xlu1 %332 }
  0xbf   : > { %v373_v3 = vmax.f32 %v327_v62, 1e-24  ;;  %v375_v4 = vmax.f32 %v333_v63, 1e-24 }
  0xc1   : > { %1095 = vrsqrt.f32 %v375_v4 }
  0xc2   : > { %v330_v5 = vpop.xlane.xlu0 %329  ;;  %v336_v7 = vpop.xlane.xlu1 %335  ;;  %1097 = vrsqrt.f32 %v373_v3 }
  0xc3   : > { %v374_v10 = vmax.f32 %v330_v5, 1e-24  ;;  %v376_v11 = vmax.f32 %v336_v7, 1e-24 }
  0xc5   : > { %1099 = vrsqrt.f32 %v374_v10 }
  0xc6   : > { %1101 = vrsqrt.f32 %v376_v11  ;;  %v342_v12 = vpop.xlane.xlu1 %341  ;;  %v339_v13 = vpop.xlane.xlu0 %338 }
  0xc7   : > { %v378_v14 = vmax.f32 %v342_v12, 1e-24  ;;  %v377_v15 = vmax.f32 %v339_v13, 1e-24 }
  0xc9   : > { %1103 = vrsqrt.f32 %v378_v14 }
  0xca   : > { %1105 = vrsqrt.f32 %v377_v15  ;;  %v348_v18 = vpop.xlane.xlu1 %347  ;;  %v345_v19 = vpop.xlane.xlu0 %344 }
  0xcb   : > { %v1096_v20 = vpop.eup %1095  ;;  %v380_v21 = vmax.f32 %v348_v18, 1e-24  ;;  %v379_v25 = vmax.f32 %v345_v19, 1e-24 }
  0xcc   : > { %v1098_v24 = vpop.eup %1097  ;;  %v407_v27 = vmul.f32 %v1096_v20, %v1333_v1 }
  0xcd   : > { %v405_v31 = vmul.f32 %v1098_v24, %v1330_v0  ;;  %1107 = vrsqrt.f32 %v380_v21  ;;  %v601_v24 = vstv %s421_s16  ;;  %s1552_s16 = scalar_lea.hbm %s1601_s7, %s1320_s19 }
  0xce   : > { %1109 = vrsqrt.f32 %v379_v25  ;;  %v354_v37 = vpop.xlane.xlu1 %353  ;;  %v351_v39 = vpop.xlane.xlu0 %350 }
  0xcf   : > { %v1100_v26 = vpop.eup %1099  ;;  %v382_v0 = vmax.f32 %v354_v37, 1e-24 }
  0xd0   : > { %v1102_v30 = vpop.eup %1101  ;;  %v406_v32 = vmul.f32 %v1100_v26, %v1336_v2  ;;  %v381_v2 = vmax.f32 %v351_v39, 1e-24 }
  0xd1   : > { %v408_v36 = vmul.f32 %v1102_v30, %v1345_v6  ;;  %1111 = vrsqrt.f32 %v382_v0 }
  0xd2   : > { %v986_v38 = vpack.c.bf16 %v406_v32, %v405_v31  ;;  %1113 = vrsqrt.f32 %v381_v2  ;;  %v360_v45 = vpop.xlane.xlu1 %359  ;;  %v357_v48 = vpop.xlane.xlu0 %356 }
  0xd3   : > { %v1104_v42 = vpop.eup %1103  ;;  %v992_v1 = vpack.c.bf16 %v408_v36, %v407_v27  ;;  %v384_v50 = vmax.f32 %v360_v45, 1e-24  ;;  %v383_v51 = vmax.f32 %v357_v48, 1e-24  ;;  %v613_v48 = vld [vmem:[%s1597_s3 + $0x18] sm:$0xff] }
  0xd4   : > { %v1106_v43 = vpop.eup %1105  ;;  %988 = vmatprep.subr.msk.bf16.mxu0 %vm1470_vm1, %v986_v38  ;;  %v410_v44 = vmul.f32 %v1104_v42, %v1350_v8 }
  0xd5   : > { %991 = vmatpush3.bf16.xpose.msk.msra.mxu0 %vm1470_vm1, %v986_v38  ;;  %v409_v6 = vmul.f32 %v1106_v43, %v1353_v9  ;;  %1115 = vrsqrt.f32 %v384_v50 }
  0xd6   : > { %994 = vmatprep.subr.msk.bf16.mxu0 %vm1470_vm1, %v992_v1  ;;  %1117 = vrsqrt.f32 %v383_v51  ;;  %v366_v8 = vpop.xlane.xlu1 %365  ;;  %v363_v55 = vpop.xlane.xlu0 %362 }
  0xd7   : > { %v1108_v46 = vpop.eup %1107  ;;  %v998_v47 = vpack.c.bf16 %v410_v44, %v409_v6  ;;  %v386_v57 = vmax.f32 %v366_v8, 1e-24  ;;  %v385_v58 = vmax.f32 %v363_v55, 1e-24  ;;  %v740_v8 = vstv %s877_s29 }
  0xd8   : > { %v1110_v49 = vpop.eup %1109  ;;  %v412_v9 = vmul.f32 %v1108_v46, %v1364_v16  ;;  %v611_v46 = vld [vmem:[%s1597_s3 + $0x8] sm:$0xff] }
  0xd9   : > { %v411_v52 = vmul.f32 %v1110_v49, %v1367_v17  ;;  %1119 = vrsqrt.f32 %v386_v57 }
  0xda   : > { %1121 = vrsqrt.f32 %v385_v58  ;;  %v372_v16 = vpop.xlane.xlu1 %371  ;;  %v369_v62 = vpop.xlane.xlu0 %368 }
  0xdb   : > { %v1112_v53 = vpop.eup %1111  ;;  %v1004_v54 = vpack.c.bf16 %v412_v9, %v411_v52  ;;  %v388_v3 = vmax.f32 %v372_v16, 1e-24  ;;  %v387_v4 = vmax.f32 %v369_v62, 1e-24 }
  0xdc   : > { %v1114_v56 = vpop.eup %1113  ;;  %v414_v17 = vmul.f32 %v1112_v53, %v1376_v22 }
  0xdd   : > { %997 = vmatpush3.bf16.xpose.msk.msra.mxu0 %vm1470_vm1, %v992_v1  ;;  %v413_v59 = vmul.f32 %v1114_v56, %v1379_v23  ;;  %1123 = vrsqrt.f32 %v388_v3 }
  0xde   : > { %1000 = vmatprep.subr.msk.bf16.mxu0 %vm1470_vm1, %v998_v47  ;;  %1125 = vrsqrt.f32 %v387_v4  ;;  %v440_v19 = vpop.permute.xlu1 %439 }
  0xdf   : > { %v1116_v60 = vpop.eup %1115  ;;  %v1010_v61 = vpack.c.bf16 %v414_v17, %v413_v59 }
  0xe0   : > { %v1118_v63 = vpop.eup %1117  ;;  %v416_v23 = vmul.f32 %v1116_v60, %v1388_v28 }
  0xe1   : > { %v415_v5 = vmul.f32 %v1118_v63, %v1391_v29 }
  0xe2   : > { %v445_v20 = vpop.permute.xlu1 %444  ;;  %v435_v25 = vpop.permute.xlu0 %434 }
  0xe3   : > { %v1120_v22 = vpop.eup %1119  ;;  %v1016_v7 = vpack.c.bf16 %v416_v23, %v415_v5 }
  0xe4   : > { %v1122_v10 = vpop.eup %1121  ;;  %v418_v12 = vmul.f32 %v1120_v22, %v1400_v34  ;;  %v425_v34 = vld [vmem:[%s1595_s1 + $0x8] sm:$0xff] }
  0xe5   : > { %1003 = vmatpush3.bf16.xpose.msk.msra.mxu0 %vm1470_vm1, %v998_v47  ;;  %v417_v11 = vmul.f32 %v1122_v10, %v1403_v35  ;;  %v426_v35 = vld [vmem:[%s1595_s1 + $0x10] sm:$0xff] }
  0xe6   : > { %1006 = vmatprep.subr.msk.bf16.mxu0 %vm1470_vm1, %v1004_v54  ;;  %v450_v32 = vpop.permute.xlu1 %449  ;;  %v612_v47 = vld [vmem:[%s1597_s3 + $0x10] sm:$0xff]  ;;  %v761_v17 = vpop.permute.xlu0 %760 }
  0xe7   : > { %v1124_v13 = vpop.eup %1123  ;;  %v1022_v14 = vpack.c.bf16 %v418_v12, %v417_v11 }
  0xe8   : > { %v1126_v29 = vpop.eup %1125  ;;  %v420_v15 = vmul.f32 %v1124_v13, %v1412_v40  ;;  %v427_v40 = vld [vmem:[%s1595_s1 + $0x18] sm:$0xff] }
  0xe9   : > { %v419_v28 = vmul.f32 %v1126_v29, %v1415_v41  ;;  %v610_v41 = vld [vmem:[%s1597_s3] sm:$0xff] }
  0xea   : > { %980 = vmatprep.mubr.msk.f32.mxu1 %vm638_vm2, %v610_v41  ;;  %v621_v49 = vpop.permute.xlu1 %620  ;;  %v771_v13 = vpop.permute.xlu0 %770  ;;  %v786_v41 = vstv %s878_s28 }
  0xeb   : > { %v1028_v18 = vpack.c.bf16 %v420_v15, %v419_v28 }
  0xed   : > { %1009 = vmatpush3.bf16.xpose.msk.msra.mxu0 %vm1470_vm1, %v1004_v54 }
  0xee   : > { %1012 = vmatprep.subr.msk.bf16.mxu0 %vm1470_vm1, %v1010_v61  ;;  %v626_v50 = vpop.permute.xlu1 %625 }
  0xf2   : > { %v631_v51 = vpop.permute.xlu1 %630 }
  0xf5   : > { %1015 = vmatpush3.bf16.xpose.msk.msra.mxu0 %vm1470_vm1, %v1010_v61 }
  0xf6   : > { %1018 = vmatprep.subr.msk.bf16.mxu0 %vm1470_vm1, %v1016_v7  ;;  %v636_v52 = vpop.permute.xlu1 %635 }
  0xfa   : > { %v756_v57 = vpop.permute.xlu1 %755 }
  0xfd   : > { %1021 = vmatpush3.bf16.xpose.msk.msra.mxu0 %vm1470_vm1, %v1016_v7 }
  0xfe   : > { %1024 = vmatprep.subr.msk.bf16.mxu0 %vm1470_vm1, %v1022_v14  ;;  %v766_v7 = vpop.permute.xlu1 %765 }
 0x105   : > { %1027 = vmatpush3.bf16.xpose.msk.msra.mxu0 %vm1470_vm1, %v1022_v14 }
 0x106   : > { %1030 = vmatprep.subr.msk.bf16.mxu0 %vm1470_vm1, %v1028_v18 }
 0x10d   : > { %1033 = vmatpush3.bf16.xpose.msk.msra.mxu0 %vm1470_vm1, %v1028_v18 }
 0x114   : > { %967 = vmatmul.mubr.msk.f32.vlgmr.msra.gmra.mrb[0].mxu0 %vm324_vm0, %v425_v34 }
 0x115   : > { %969 = vmatprep.mubr.msk.f32.mxu0 %vm324_vm0, %v426_v35 }
 0x118   : > { %970 = vmatmul.mubr.msk.f32.gmra.mrb[2].mxu0 %vm324_vm0, %v427_v40 }
 0x1e7   : > { %v968_v21 = vpop.f32.mrb[0].mxu0 }
 0x1e8   : > { %v584_v26 = vadd.f32 %v968_v21, %v440_v19  ;;  %v578_v27 = vpop.f32.mrb[1].mxu0 }
 0x1e9   : > { %v579_v30 = vadd.f32 %v578_v27, %v435_v25 }
 0x1ea   : > { %v603_v31 = vmul.f32 %v601_v24, %v584_v26  ;;  %vm598_vm3 = vcmp.ge.f32.partialorder %v584_v26, 0.0 }
 0x1eb   : > { %v602_v33 = vmul.f32 %v601_v24, %v579_v30  ;;  %v971_v36 = vpop.f32.mrb[2].mxu0  ;;  %vm597_vm4 = vcmp.ge.f32.partialorder %v579_v30, 0.0 }
 0x1ec   : > { %v594_v37 = vadd.f32 %v971_v36, %v450_v32  ;;  %v588_v38 = vpop.f32.mrb[3].mxu0  ;;  %v607_v39 = vsel %vm598_vm3, %v584_v26, %v603_v31 }
 0x1ed   : > { %v589_v42 = vadd.f32 %v588_v38, %v445_v20  ;;  %v606_v1 = vsel %vm597_vm4, %v579_v30, %v602_v33 }
 0x1ee   : > { %vm600_vm5 = vcmp.ge.f32.partialorder %v594_v37, 0.0  ;;  %v605_v43 = vmul.f32 %v601_v24, %v594_v37  ;;  %v1034_v0 = vpack.c.bf16 %v607_v39, %v606_v1 }
 0x1ef   : > { %vm599_vm6 = vcmp.ge.f32.partialorder %v589_v42, 0.0  ;;  %v604_v2 = vmul.f32 %v601_v24, %v589_v42 }
 0x1f0   : > { %1035 = vmatprep.subr.bf16.mxu1 %v1034_v0  ;;  %v609_v6 = vsel %vm600_vm5, %v594_v37, %v605_v43 }
 0x1f1   : > { %1037 = vmatpush3.bf16.msra.mxu1 %v1034_v0  ;;  %v608_v44 = vsel %vm599_vm6, %v589_v42, %v604_v2 }
 0x1f2   : > { %v1038_v45 = vpack.c.bf16 %v609_v6, %v608_v44 }
 0x1f4   : > { %1039 = vmatprep.subr.bf16.mxu1 %v1038_v45 }
 0x1f5   : > { %1041 = vmatpush3.bf16.msra.mxu1 %v1038_v45 }
 0x1f8   : > { %981 = vmatmul.mubr.msk.f32.vlgmr.msra.gmra.mrb[0].mxu1 %vm638_vm2, %v611_v46 }
 0x1f9   : > { %983 = vmatprep.mubr.msk.f32.mxu1 %vm638_vm2, %v612_v47 }
 0x1fc   : > { %984 = vmatmul.mubr.msk.f32.gmra.mrb[2].mxu1 %vm638_vm2, %v613_v48 }
 0x2cb   : > { %v982_v9 = vpop.f32.mrb[0].mxu1 }
 0x2cc   : > { %v723_v53 = vadd.f32 %v982_v9, %v626_v50  ;;  %v717_v54 = vpop.f32.mrb[1].mxu1 }
 0x2cd   : > { %v718_v55 = vadd.f32 %v717_v54, %v621_v49 }
 0x2ce   : > { %vm737_vm7 = vcmp.ge.f32.partialorder %v723_v53, 0.0  ;;  %v742_v56 = vmul.f32 %v740_v8, %v723_v53 }
 0x2cf   : > { %vm736_vm8 = vcmp.ge.f32.partialorder %v718_v55, 0.0  ;;  %v741_v58 = vmul.f32 %v740_v8, %v718_v55  ;;  %v985_v59 = vpop.f32.mrb[2].mxu1 }
 0x2d0   : > { %v746_v16 = vsel %vm737_vm7, %v723_v53, %v742_v56  ;;  %v733_v60 = vadd.f32 %v985_v59, %v636_v52  ;;  %v727_v61 = vpop.f32.mrb[3].mxu1 }
 0x2d1   : > { %v774_v62 = vmul.f32 %v761_v17, %v746_v16  ;;  %v745_v63 = vsel %vm736_vm8, %v718_v55, %v741_v58  ;;  %v728_v3 = vadd.f32 %v727_v61, %v631_v51 }
 0x2d2   : > { %v773_v4 = vmul.f32 %v756_v57, %v745_v63  ;;  %vm739_vm9 = vcmp.ge.f32.partialorder %v733_v60, 0.0  ;;  %v744_v5 = vmul.f32 %v740_v8, %v733_v60 }
 0x2d3   : > { %vm738_vm10 = vcmp.ge.f32.partialorder %v728_v3, 0.0  ;;  %v743_v23 = vmul.f32 %v740_v8, %v728_v3 }
 0x2d4   : > { %v777_v22 = vadd.f32 %v774_v62, %v773_v4  ;;  %v748_v10 = vsel %vm739_vm9, %v733_v60, %v744_v5 }
 0x2d5   : > { %v747_v11 = vsel %vm738_vm10, %v728_v3, %v743_v23  ;;  %v776_v14 = vmul.f32 %v771_v13, %v748_v10 }
 0x2d6   : > { %v775_v12 = vmul.f32 %v766_v7, %v747_v11 }
 0x2d8   : > { %v778_v29 = vadd.f32 %v777_v22, %v775_v12 }
 0x2da   : > { %v779_v28 = vadd.f32 %v778_v29, %v776_v14 }
 0x2dc   : > { %v780_v15 = vrot.slane %v779_v28, 4 }
 0x2de   : > { %v781_v18 = vadd.f32 %v780_v15, %v779_v28 }
 0x2e0   : > { %v782_v34 = vrot.slane %v781_v18, 2 }
 0x2e2   : > { %v783_v35 = vadd.f32 %v782_v34, %v781_v18 }
 0x2e4   : > { %v784_v40 = vrot.slane %v783_v35, 1 }
 0x2e6   : > { %v785_v19 = vadd.f32 %v784_v40, %v783_v35 }
 0x2e8   : > { %v787_v20 = vadd.f32 %v786_v41, %v785_v19 }
 0x2ea   : > { %788 = vst [vmem:[%s285_s9] sm:$0x1] %v787_v20 }
 0x2eb   : > { %1155 = shalt.err (!%p1152_p2)
}
 0x2ec   : > { %s1156_s19 = scalar_lea.hbm %s1552_s16, 16  ;;  %s1160_s28 = scalar_lea.hbm %s1601_s7, 32 }
 0x2ed   : > { %p1157_p3 = scmp.ne.s32.totalorder %s1552_s16, %s1156_s19  ;;  %p1161_p8 = scmp.lt.u32.totalorder %s1552_s16, %s1601_s7 }
 0x2ee   : > { %p1162_p11 = scmp.lt.u32.totalorder %s1160_s28, %s1156_s19  ;;  %p1164_p10 = scmp.lt.u32.totalorder %s1156_s19, %s1552_s16 }
 0x2ef   : > { %p1158_p4 = pnand %p1157_p3, %p1291_p5 }
 0x2f0   : > { %p1163_p9 = por %p1162_p11, %p1161_p8 }
 0x2f1   : > { %p1159_p7 = pneg %p1158_p4 }
 0x2f2   : > { %p1165_p12 = por %p1164_p10, %p1163_p9 }
 0x2f4   : > { %p1166_p13 = pnand %p1165_p12, %p1159_p7 }
 0x2f6   : > { %1169 = shalt.err (!%p1166_p13)
}
 0x2f7   : > { %1046 = dma.vmem_to_hbm [thread:$0]  (%p1291_p5), %s1554_s13, 16, %s1552_s16, %s790_s17  }
 0x2f8 PF: > { %p1058_p0 = scmp.ge.s32.totalorder %s1208_s27, 2  ;;  %s814_s14 = sand.u32 1, %s1196_s24  }
 0x2f9   : > { %s815_s15 = scalar_lea.sflag [#allocation3], %s814_s14 }
 0x2fa   : > { %p1053_p1 = pnand %p1058_p0, %p1295_p6 }
 0x2fc   : > { %1191 = dma.done.wait (!%p1053_p1), %s815_s15, 16  }
 0x2fd   : > { %1193 = vsyncadd (!%p1053_p1), %s815_s15, 4294967280  ;;  %p18_p2 = scmp.ge.s32.totalorder %s1278_s30, 4   ;;  %s1607_s24 = smov %s1200_s25 }
 0x2fe   : > { %s1608_s25 = smov %s1204_s26  ;;  %s1609_s26 = smov %s1289_s10 }
 0x2ff   : > { %s1610_s27 = smov %s1278_s30  ;;  %20 = sbr.rel (!%p18_p2) target bundleno = 4 (0x4), region = 88 }
 0x306   :  { %819 = vsyncpa [#allocation3], 1 }
 0x307   :  { %821 = vsyncpa [#allocation3 + $0x1], 1 }
 0x308   :  { %822 = vsyncpa [#allocation4], 1 }
 0x309   :  { %824 = vsyncpa [#allocation4 + $0x1], 1 }

</bundles_post_ra>
